<compile_context>
chip_gen: v7x
topology: tpu7x:2x2x1
jax: 0.10.0
libtpu: 0.0.40
codegen_flags: <defaults>
</compile_context>

<pallas_src>
import functools

import jax
import jax.numpy as jnp
from jax.experimental import pallas as pl
from jax.experimental.pallas import tpu as pltpu


_VMEM_BUDGET = 24 * 1024 * 1024   # per-step streaming budget (double-buffered tiles)
_VMEM_LIMIT = 48 * 1024 * 1024    # scoped VMEM limit; safely under v7x's 64 MiB physical


def _round_up(x, m):
    return (x + m - 1) // m * m


def _cdiv(a, b):
    return (a + b - 1) // b


def _pick_thw(hw, ck, c2p, in_bytes, thw_max):
    """Spatial (lane) tile width: as large as the VMEM budget allows, multiple of 128."""
    per_col = 2 * ck * in_bytes + 2 * c2p * 4   # double-buffered input + f32 output per column
    cap = max(128, (_VMEM_BUDGET // per_col) // 128 * 128)
    thw = min(int(thw_max), cap, _round_up(hw, 128))
    return max(128, thw // 128 * 128)


def _stats_kernel(x_ref, stats_ref):
    """Accumulate [G | s], G = X X^T and s = rowsum(X), across the (image, tile) grid axes."""
    @pl.when((pl.program_id(1) == 0) & (pl.program_id(2) == 0))
    def _():
        stats_ref[...] = jnp.zeros_like(stats_ref)

    xq = x_ref[0].astype(jnp.bfloat16)                                    # (CK, THW)
    g = jax.lax.dot_general(xq, xq, (((1,), (1,)), ((), ())),
                            preferred_element_type=jnp.float32)           # (CK, CK)
    s = jnp.sum(xq.astype(jnp.float32), axis=1, keepdims=True)            # (CK, 1)
    stats_ref[0] = stats_ref[0] + jnp.concatenate([g, s], axis=1)


def _apply_kernel(x_ref, w_ref, scale_ref, bias_ref, o_ref):
    """y = W @ X, fused per-channel FMA (BN) + ReLU, lane-dense store."""
    xq = x_ref[0].astype(jnp.bfloat16)                                    # (CK, THW)
    y = jnp.dot(w_ref[...], xq, preferred_element_type=jnp.float32)       # (C2p, THW)
    y = y * scale_ref[...] + bias_ref[...]
    o_ref[0] = jnp.maximum(y, jnp.float32(0.0)).astype(o_ref.dtype)


def _im2col_t(x, k, s, p):
    """x: (N, C, H, W) -> patches (C*k*k, N*Ho*Wo) with (C, kh, kw) feature order, plus Ho, Wo."""
    n, c, h, w = x.shape
    xp = jnp.pad(x, ((0, 0), (0, 0), (p, p), (p, p)))
    ho = (h + 2 * p - k) // s + 1
    wo = (w + 2 * p - k) // s + 1
    cols = []
    for i in range(k):
        for j in range(k):
            cols.append(xp[:, :, i:i + (ho - 1) * s + 1:s, j:j + (wo - 1) * s + 1:s])
    patches = jnp.stack(cols, axis=2)                                      # (N, C, k*k, Ho, Wo)
    a_t = patches.transpose(1, 2, 0, 3, 4).reshape(c * k * k, n * ho * wo)
    return a_t, ho, wo


@functools.partial(jax.jit, static_argnames=("k", "s", "p", "g", "thw_max"))
def conv_module_forward(x, weight, gamma, beta, *, k=1, s=1, p=0, g=1, thw_max=8192):
    """ConvModule.forward.  x: NCHW float32, weight: (C2, C1, k, k). Returns NCHW float32."""
    assert g == 1  # TODO(synk): grouped convolution (g > 1) not implemented.
    n, c1, h, w = x.shape
    c2 = weight.shape[0]

    fast_1x1 = (k == 1 and s == 1 and p == 0)
    if fast_1x1:
        # 1x1 conv: NCHW-native, zero-copy (N, C1, H*W) view -- no layout transposes.
        ho, wo = h, w
        n_img, ck, hw = n, c1, h * w
        x_r = x.reshape(n, c1, hw)
    else:
        # TODO(synk): in-kernel haloed-tile windowing instead of host-side im2col for k > 1.
        a_t, ho, wo = _im2col_t(x.astype(jnp.bfloat16), k, s, p)
        n_img, ck, hw = 1, c1 * k * k, n * ho * wo
        x_r = a_t.reshape(1, ck, hw)

    c2p = _round_up(c2, 8)

    # Spatial (lane) tiling; tiles split across 2 cores for the stats pass when possible.
    in_bytes = 4 if fast_1x1 else 2
    thw = _pick_thw(hw, ck, c2p, in_bytes, thw_max)
    tiles = _cdiv(_round_up(hw, 128), thw)
    ncores = 2 if tiles >= 2 else 1            # per-core partial stats (v7x megacore)
    t_core = _cdiv(tiles, ncores)
    hwp = ncores * t_core * thw

    if fast_1x1 and hwp == hw:
        x_feed = x_r   # f32 feed, cast to bf16 in-kernel (fewer HBM bytes than a wrapper cast)
    else:
        x_feed = jnp.pad(x_r, ((0, 0), (0, 0), (0, hwp - hw))).astype(jnp.bfloat16)

    wm_p = jnp.pad(weight.reshape(c2, ck),
                   ((0, c2p - c2), (0, 0))).astype(jnp.bfloat16)            # (C2p, CK)

    # ---- pass 1: Gram-matrix BN statistics (tiling-safe, per-core partials) ----
    stats = pl.pallas_call(
        _stats_kernel,
        out_shape=jax.ShapeDtypeStruct((ncores, ck, ck + 1), jnp.float32),
        grid=(ncores, n_img, t_core),
        in_specs=[pl.BlockSpec((1, ck, thw),
                               lambda c, i, t: (i, 0, c * t_core + t))],
        out_specs=pl.BlockSpec((1, ck, ck + 1), lambda c, i, t: (c, 0, 0)),
        compiler_params=pltpu.CompilerParams(
            dimension_semantics=("parallel", "arbitrary", "arbitrary"),
            vmem_limit_bytes=_VMEM_LIMIT),
    )(x_feed)

    stats = jnp.sum(stats, axis=0)                        # combine per-core partials
    gram = stats[:, :ck]                                  # (CK, CK)
    svec = stats[:, ck]                                   # (CK,)
    wq = wm_p.astype(jnp.float32)                         # bf16-quantized weights (match pass 2)
    count = jnp.float32(n * ho * wo)                      # true (unpadded) element count
    sum_y = wq @ svec                                     # per-channel sum of conv output
    sumsq_y = jnp.sum((wq @ gram) * wq, axis=1)           # per-channel sum of squares
    mean = sum_y / count
    var = jnp.maximum(sumsq_y / count - mean * mean, 0.0)    # biased variance, clamped >= 0
    inv_std = jax.lax.rsqrt(var + jnp.float32(1e-3))
    gamma_p = jnp.pad(gamma.astype(jnp.float32), (0, c2p - c2))
    beta_p = jnp.pad(beta.astype(jnp.float32), (0, c2p - c2))
    # Scale/bias stay f32 in-kernel (not folded into bf16 weights) to preserve conv numerics.
    scale = (gamma_p * inv_std).reshape(c2p, 1)
    bias = (beta_p - mean * gamma_p * inv_std).reshape(c2p, 1)

    # ---- pass 2: streaming matmul + BN apply (one FMA / element) + ReLU ----
    out_p = pl.pallas_call(
        _apply_kernel,
        out_shape=jax.ShapeDtypeStruct((n_img, c2p, hwp), jnp.float32),
        grid=(n_img, ncores * t_core),
        in_specs=[
            pl.BlockSpec((1, ck, thw), lambda i, t: (i, 0, t)),
            pl.BlockSpec((c2p, ck), lambda i, t: (0, 0)),
            pl.BlockSpec((c2p, 1), lambda i, t: (0, 0)),
            pl.BlockSpec((c2p, 1), lambda i, t: (0, 0)),
        ],
        out_specs=pl.BlockSpec((1, c2p, thw), lambda i, t: (i, 0, t)),
        compiler_params=pltpu.CompilerParams(
            dimension_semantics=("parallel", "parallel"),
            vmem_limit_bytes=_VMEM_LIMIT),
    )(x_feed, wm_p, scale, bias)

    if fast_1x1:
        # Already NCHW; the slice is a no-op when no channel/spatial padding was added.
        return out_p[:, :c2, :hw].reshape(n, c2, h, w)
    # im2col path: result is (C2, N*Ho*Wo) -> one batch/channel swap back to NCHW.
    return out_p[0, :c2, :hw].reshape(c2, n, ho, wo).transpose(1, 0, 2, 3)


def _reference(x, weight, gamma, beta, *, k, s, p):
    # Conv with bf16 inputs / f32 accumulation to match the kernel's MXU numerics.
    y = jax.lax.conv_general_dilated(
        x.astype(jnp.bfloat16), weight.astype(jnp.bfloat16),
        window_strides=(s, s), padding=((p, p), (p, p)),
        dimension_numbers=("NCHW", "OIHW", "NCHW"),
        preferred_element_type=jnp.float32)
    mean = y.mean(axis=(0, 2, 3), keepdims=True)
    var = y.var(axis=(0, 2, 3), keepdims=True)          # biased, like PyTorch training-mode BN
    yn = (y - mean) * jax.lax.rsqrt(var + 1e-3)
    yn = yn * gamma.reshape(1, -1, 1, 1) + beta.reshape(1, -1, 1, 1)
    return jnp.maximum(yn, 0.0)


if __name__ == "__main__":
    key = jax.random.PRNGKey(0)

    cases = [
        dict(n=2, h=16, w=16, c1=4, c2=8, k=1, s=1, p=0),                 # module defaults (1x1)
        dict(n=2, h=16, w=16, c1=4, c2=8, k=3, s=1, p=1),                 # 3x3 same-padding
        dict(n=2, h=32, w=32, c1=4, c2=8, k=3, s=2, p=1),                 # strided 3x3
        dict(n=2, h=20, w=20, c1=4, c2=8, k=1, s=1, p=0),                 # 1x1, lane pad 400->512
        dict(n=2, h=30, w=30, c1=4, c2=8, k=3, s=2, p=1),                 # im2col rows 450->512
        dict(n=1, h=64, w=64, c1=4, c2=8, k=1, s=1, p=0, thw_max=1024),   # 4 tiles, 2-core stats
        dict(n=2, h=48, w=48, c1=4, c2=8, k=1, s=1, p=0, thw_max=1024),   # multi-image + padding
    ]

    for cfg in cases:
        n, h, w = cfg["n"], cfg["h"], cfg["w"]
        c1, c2, k, s, p = cfg["c1"], cfg["c2"], cfg["k"], cfg["s"], cfg["p"]
        thw_max = cfg.get("thw_max", 8192)
        key, kx, kw, kg, kb = jax.random.split(key, 5)
        x = jax.random.normal(kx, (n, c1, h, w), dtype=jnp.float32)
        weight = jax.random.normal(kw, (c2, c1, k, k), dtype=jnp.float32) * 0.1
        gamma = 1.0 + 0.1 * jax.random.normal(kg, (c2,), dtype=jnp.float32)
        beta = 0.1 * jax.random.normal(kb, (c2,), dtype=jnp.float32)

        out = conv_module_forward(x, weight, gamma, beta, k=k, s=s, p=p, g=1, thw_max=thw_max)
        out = jax.block_until_ready(out)

        ref = _reference(x, weight, gamma, beta, k=k, s=s, p=p)
        assert out.shape == ref.shape, (cfg, out.shape, ref.shape)
        err = float(jnp.max(jnp.abs(out - ref)))
        assert jnp.allclose(out, ref, rtol=1e-2, atol=1e-2), (cfg, err)

    print("KERNEL_OK")
</pallas_src>

<mosaic_0001>
module attributes {stable_mosaic.version = 11 : i64} {
  func.func @_stats_kernel(%arg0: i32, %arg1: i32, %arg2: i32, %arg3: memref<1x4x256xf32, #tpu.memory_space<vmem>>, %arg4: memref<1x4x5xf32, #tpu.memory_space<vmem>>) attributes {dimension_semantics = [#tpu.dimension_semantics<parallel>, #tpu.dimension_semantics<arbitrary>, #tpu.dimension_semantics<arbitrary>], iteration_bounds = array<i64: 1, 2, 1>, scalar_prefetch = 0 : i64, scratch_operands = 0 : i64, tpu.core_type = #tpu.core_type<tc>, window_params = [{transform_indices = @transform_0, window_bounds = array<i64: 1, 4, 256>}, {transform_indices = @transform_1, window_bounds = array<i64: 1, 4, 5>}]} {
    %c0_i32 = arith.constant 0 : i32
    %0 = arith.cmpi eq, %arg1, %c0_i32 : i32
    %c0_i32_0 = arith.constant 0 : i32
    %1 = arith.cmpi eq, %arg2, %c0_i32_0 : i32
    %2 = arith.andi %0, %1 : i1
    %3 = arith.extui %2 : i1 to i32
    %c0_i32_1 = arith.constant 0 : i32
    %4 = arith.cmpi ne, %3, %c0_i32_1 : i32
    scf.if %4 {
      %cst_11 = arith.constant 0.000000e+00 : f32
      %19 = vector.broadcast %cst_11 : f32 to vector<1x4x5xf32>
      %c0_12 = arith.constant 0 : index
      %c0_13 = arith.constant 0 : index
      %c0_14 = arith.constant 0 : index
      %20 = vector.load %arg4[%c0_12, %c0_13, %c0_14] : memref<1x4x5xf32, #tpu.memory_space<vmem>>, vector<1x4x5xf32>
      tpu.vector_store %arg4[%c0_12, %c0_13, %c0_14], %19 {strides = array<i32>} : memref<1x4x5xf32, #tpu.memory_space<vmem>>, vector<1x4x5xf32>,
    } else {
    }
    %c0 = arith.constant 0 : index
    %c0_2 = arith.constant 0 : index
    %c0_3 = arith.constant 0 : index
    %5 = vector.load %arg3[%c0, %c0_2, %c0_3] : memref<1x4x256xf32, #tpu.memory_space<vmem>>, vector<1x4x256xf32>
    %6 = vector.shape_cast %5 : vector<1x4x256xf32> to vector<4x256xf32>
    %7 = arith.truncf %6 : vector<4x256xf32> to vector<4x256xbf16>
    %cst = arith.constant dense<0.000000e+00> : vector<4x4xf32>
    %8 = tpu.matmul %7, %7, %cst {dimension_numbers = #tpu.dot_dimension_numbers<[1], [1], [0], [0], [0, 0, 1, 0], [], []>} : vector<4x256xbf16>, vector<4x256xbf16>, vector<4x4xf32> -> vector<4x4xf32>
    %9 = arith.extf %7 : vector<4x256xbf16> to vector<4x256xf32>
    %cst_4 = arith.constant dense<0.000000e+00> : vector<4xf32>
    %10 = vector.multi_reduction <add>, %9, %cst_4 [1] : vector<4x256xf32> to vector<4xf32>
    %11 = vector.shape_cast %10 : vector<4xf32> to vector<4x1xf32>
    %c0_5 = arith.constant 0 : index
    %c0_6 = arith.constant 0 : index
    %c0_7 = arith.constant 0 : index
    %12 = vector.load %arg4[%c0_5, %c0_6, %c0_7] : memref<1x4x5xf32, #tpu.memory_space<vmem>>, vector<1x4x5xf32>
    %13 = vector.shape_cast %12 : vector<1x4x5xf32> to vector<4x5xf32>
    %14 = tpu.concatenate %8, %11 in 1 : vector<4x4xf32>, vector<4x1xf32> -> vector<4x5xf32>
    %15 = arith.addf %13, %14 : vector<4x5xf32>
    %c0_8 = arith.constant 0 : index
    %c0_9 = arith.constant 0 : index
    %c0_10 = arith.constant 0 : index
    %16 = vector.load %arg4[%c0_8, %c0_9, %c0_10] : memref<1x4x5xf32, #tpu.memory_space<vmem>>, vector<1x4x5xf32>
    %17 = vector.shape_cast %16 : vector<1x4x5xf32> to vector<4x5xf32>
    %18 = vector.shape_cast %15 : vector<4x5xf32> to vector<1x4x5xf32>
    tpu.vector_store %arg4[%c0_8, %c0_9, %c0_10], %18 {strides = array<i32>} : memref<1x4x5xf32, #tpu.memory_space<vmem>>, vector<1x4x5xf32>,
    return
  }
  func.func @transform_0(%arg0: i32, %arg1: i32, %arg2: i32) -> (i32, i32, i32) {
    %c1_i32 = arith.constant 1 : i32
    %0 = arith.muli %arg0, %c1_i32 : i32
    %1 = arith.addi %0, %arg2 : i32
    %c0_i32 = arith.constant 0 : i32
    %c0_i32_0 = arith.constant 0 : i32
    return %arg1, %c0_i32, %1 : i32, i32, i32
  }
  func.func @transform_1(%arg0: i32, %arg1: i32, %arg2: i32) -> (i32, i32, i32) {
    %c0_i32 = arith.constant 0 : i32
    %c0_i32_0 = arith.constant 0 : i32
    %c0_i32_1 = arith.constant 0 : i32
    return %arg0, %c0_i32, %c0_i32_0 : i32, i32, i32
  }
}

module attributes {stable_mosaic.version = 11 : i64} {
  func.func @_apply_kernel(%arg0: i32, %arg1: i32, %arg2: memref<1x4x256xf32, #tpu.memory_space<vmem>>, %arg3: memref<8x4xbf16, #tpu.memory_space<vmem>>, %arg4: memref<8x1xf32, #tpu.memory_space<vmem>>, %arg5: memref<8x1xf32, #tpu.memory_space<vmem>>, %arg6: memref<1x8x256xf32, #tpu.memory_space<vmem>>) attributes {dimension_semantics = [#tpu.dimension_semantics<parallel>, #tpu.dimension_semantics<parallel>], iteration_bounds = array<i64: 2, 1>, scalar_prefetch = 0 : i64, scratch_operands = 0 : i64, tpu.core_type = #tpu.core_type<tc>, window_params = [{transform_indices = @transform_0, window_bounds = array<i64: 1, 4, 256>}, {pipeline_mode = #tpu.pipeline_mode<synchronous>, transform_indices = @transform_1, window_bounds = array<i64: 8, 4>}, {pipeline_mode = #tpu.pipeline_mode<synchronous>, transform_indices = @transform_2, window_bounds = array<i64: 8, 1>}, {pipeline_mode = #tpu.pipeline_mode<synchronous>, transform_indices = @transform_3, window_bounds = array<i64: 8, 1>}, {transform_indices = @transform_4, window_bounds = array<i64: 1, 8, 256>}]} {
    %c0 = arith.constant 0 : index
    %c0_0 = arith.constant 0 : index
    %c0_1 = arith.constant 0 : index
    %0 = vector.load %arg2[%c0, %c0_0, %c0_1] : memref<1x4x256xf32, #tpu.memory_space<vmem>>, vector<1x4x256xf32>
    %1 = vector.shape_cast %0 : vector<1x4x256xf32> to vector<4x256xf32>
    %2 = arith.truncf %1 : vector<4x256xf32> to vector<4x256xbf16>
    %c0_2 = arith.constant 0 : index
    %c0_3 = arith.constant 0 : index
    %3 = vector.load %arg3[%c0_2, %c0_3] : memref<8x4xbf16, #tpu.memory_space<vmem>>, vector<8x4xbf16>
    %cst = arith.constant dense<0.000000e+00> : vector<8x256xf32>
    %4 = tpu.matmul %3, %2, %cst {dimension_numbers = #tpu.dot_dimension_numbers<[1], [0], [0], [1], [0, 0, 1, 1], [], []>} : vector<8x4xbf16>, vector<4x256xbf16>, vector<8x256xf32> -> vector<8x256xf32>
    %c0_4 = arith.constant 0 : index
    %c0_5 = arith.constant 0 : index
    %5 = vector.load %arg4[%c0_4, %c0_5] : memref<8x1xf32, #tpu.memory_space<vmem>>, vector<8x1xf32>
    %6 = vector.broadcast %5 : vector<8x1xf32> to vector<8x256xf32>
    %7 = arith.mulf %4, %6 : vector<8x256xf32>
    %c0_6 = arith.constant 0 : index
    %c0_7 = arith.constant 0 : index
    %8 = vector.load %arg5[%c0_6, %c0_7] : memref<8x1xf32, #tpu.memory_space<vmem>>, vector<8x1xf32>
    %9 = vector.broadcast %8 : vector<8x1xf32> to vector<8x256xf32>
    %10 = arith.addf %7, %9 : vector<8x256xf32>
    %cst_8 = arith.constant 0.000000e+00 : f32
    %11 = vector.broadcast %cst_8 : f32 to vector<8x256xf32>
    %12 = arith.maximumf %10, %11 : vector<8x256xf32>
    %c0_9 = arith.constant 0 : index
    %c0_10 = arith.constant 0 : index
    %c0_11 = arith.constant 0 : index
    %13 = vector.load %arg6[%c0_9, %c0_10, %c0_11] : memref<1x8x256xf32, #tpu.memory_space<vmem>>, vector<1x8x256xf32>
    %14 = vector.shape_cast %13 : vector<1x8x256xf32> to vector<8x256xf32>
    %15 = vector.shape_cast %12 : vector<8x256xf32> to vector<1x8x256xf32>
    tpu.vector_store %arg6[%c0_9, %c0_10, %c0_11], %15 {strides = array<i32>} : memref<1x8x256xf32, #tpu.memory_space<vmem>>, vector<1x8x256xf32>,
    return
  }
  func.func @transform_0(%arg0: i32, %arg1: i32) -> (i32, i32, i32) {
    %c0_i32 = arith.constant 0 : i32
    %c0_i32_0 = arith.constant 0 : i32
    return %arg0, %c0_i32, %arg1 : i32, i32, i32
  }
  func.func @transform_1(%arg0: i32, %arg1: i32) -> (i32, i32) {
    %c0_i32 = arith.constant 0 : i32
    %c0_i32_0 = arith.constant 0 : i32
    %c0_i32_1 = arith.constant 0 : i32
    return %c0_i32, %c0_i32_0 : i32, i32
  }
  func.func @transform_2(%arg0: i32, %arg1: i32) -> (i32, i32) {
    %c0_i32 = arith.constant 0 : i32
    %c0_i32_0 = arith.constant 0 : i32
    %c0_i32_1 = arith.constant 0 : i32
    return %c0_i32, %c0_i32_0 : i32, i32
  }
  func.func @transform_3(%arg0: i32, %arg1: i32) -> (i32, i32) {
    %c0_i32 = arith.constant 0 : i32
    %c0_i32_0 = arith.constant 0 : i32
    %c0_i32_1 = arith.constant 0 : i32
    return %c0_i32, %c0_i32_0 : i32, i32
  }
  func.func @transform_4(%arg0: i32, %arg1: i32) -> (i32, i32, i32) {
    %c0_i32 = arith.constant 0 : i32
    %c0_i32_0 = arith.constant 0 : i32
    return %arg0, %c0_i32, %arg1 : i32, i32, i32
  }
}

</mosaic_0001>

<bundles_post_ra>
// kernel: conv_module_forward.2
= control target key start
LH: loop header
LB: loop body
LE: loop exit
PB: predicated region body
PF: predicated region fallthrough
CT: control target
= control target key end

     0   :  { %s367_s6 = smov 0   ;;  %s369_s7 = smov 0   ;;  %s406_s0 = inlined_call_operand.vmem [shape: f32[2,4,256], index: 0, kind: input, shape index: {}]   ;;  %s407_s1 = inlined_call_operand.vmem [shape: f32[1,4,5], index: 1, kind: output, shape index: {}]  }
   0x1   :  { %s371_s8 = smov 0  }
   0x2 LB: > { %s26_s9 = sadd.s32 1, %s350_s7  ;;  %p297_p0 = scmp.ge.s32.totalorder %s354_s8, 1  ;;  %s354_s8 = sphi %s371_s8, %s11_s8   ;;  %s350_s7 = sphi %s369_s7, %s409_s7   ;;  %s346_s6 = sphi %s367_s6, %s408_s6  }
   0x3   : > { %p28_p1 = scmp.ge.s32.totalorder %s26_s9, 2  ;;  %p117_p2 = scmp.lt.s32.totalorder %s354_s8, 3 }
   0x5   : > { %s411_s9 = smov (%p28_p1, %s26_s9), 0  ;;  %p118_p3 = pnand %p297_p0, %p117_p2 }
   0x6   : > { %p143_p4 = scmp.lt.s32.totalorder (!%p118_p3), %s346_s6, 1  ;;  %p158_p5 = scmp.eq.s32.totalorder (!%p118_p3), %s346_s6, 0 }
   0x7   : > { %121 = sbr.rel (%p118_p3) target bundleno = 250 (0xfa), region = 24 }
   0xe   : > { %s413_s6 = smov (!%p143_p4, %s346_s6), 1  ;;  %163 = sbr.rel (!%p158_p5) target bundleno = 21 (0x15), region = 28 }
   0xf   : > { %s304_s10 = sshll.u32 %s413_s6, 3  ;;  %vm164_vm0 = vcmask (%p158_p5), 35840   ;;  %v356_v0 = vmov (%p158_p5), 0.0  }
  0x10   : > { %s150_s13 = scalar_lea.vmem %s406_s0, %s304_s10  ;;  %165 = vst.msk [vmem:[%s407_s1] sm:$0xf] (%p158_p5), %vm164_vm0, %v356_v0 }
  0x15 PF: > { %v166_v1 = vld [vmem:[%s150_s13] sm:$0xff]  ;;  %vm214_vm1 = vcmask 1043456   ;;  %vm221_vm2 = vcmask 31744   ;;  %vm224_vm3 = vcmask 35840  }
  0x16   : > { %v168_v2 = vcombine.high %v166_v1, %v166_v1  ;;  %v170_v3 = vpack.c.bf16 %v166_v1, %v166_v1 }
  0x17   : > { %v220_v11 = vld [vmem:[%s407_s1] sm:$0xf] }
  0x18   : > { %v171_v4 = vpack.c.bf16 %v168_v2, %v168_v2  ;;  %v212_v5 = vunpack.c.l.bf16 %v170_v3 }
  0x1a   : > { %172 = vmatprep.subr.bf16.mxu0 %v171_v4  ;;  %204 = vmatprep.mubr.bf16.mxu0 %v171_v4  ;;  %v213_v6 = vunpack.c.l.bf16 %v171_v4  ;;  %v215_v7 = vsel %vm214_vm1, %v212_v5, 0.0 }
  0x1b   : > { %173 = vmatpush1.bf16.xpose.msra.mxu0 %v170_v3 }
  0x1c   : > { %v216_v8 = vsel %vm214_vm1, %v213_v6, 0.0 }
  0x1d   : > { %v217_v9 = vadd.f32 %v216_v8, %v215_v7 }
  0x1f   : > { %218 = vadd.xlane.f32.xlu0 %v217_v9 }
  0x22   : > { %205 = vmatmul.mubr.bf16.vlgmr.msra.gmra.mrb[0].mxu0 %v170_v3 }
  0xac   : > { %v219_v10 = vpop.xlane.xlu0 %218 }
  0xf5   : > { %v206_v12 = vpop.f32.mrb[0].mxu0 }
  0xf6   : > { %v222_v13 = vsel %vm221_vm2, %v206_v12, %v219_v10  ;;  %v208_v14 = vpop.f32.mrb[1].mxu0 }
  0xf7   : > { %v223_v15 = vadd.f32 %v222_v13, %v220_v11  ;;  %v209_v16 = vpop.f32.mrb[2].mxu0 }
  0xf8   : > { %v210_v17 = vpop.f32.mrb[3].mxu0 }
  0xf9   : > { %225 = vst.msk [vmem:[%s407_s1] sm:$0xf] %vm224_vm3, %v223_v15 }
  0xfa PF: > { %s11_s8 = sadd.s32 1, %s354_s8   ;;  %s408_s6 = smov %s350_s7 }
  0xfb   : > { %p8_p6 = scmp.ge.s32.totalorder %s11_s8, 4   ;;  %s409_s7 = smov %s411_s9 }
  0xfd   :  { %10 = sbr.rel (!%p8_p6) target bundleno = 2 (0x2), region = 58 }

// kernel: conv_module_forward.3
= control target key start
LH: loop header
LB: loop body
LE: loop exit
PB: predicated region body
PF: predicated region fallthrough
CT: control target
= control target key end

     0   :  { %s496_s15 = smov 0   ;;  %s498_s16 = smov 0   ;;  %s538_s0 = inlined_call_operand.vmem [shape: f32[2,4,256], index: 0, kind: input, shape index: {}]   ;;  %s539_s1 = inlined_call_operand.vmem [shape: bf16[8,4], index: 1, kind: input, shape index: {}]   ;;  %s540_s2 = inlined_call_operand.vmem [shape: f32[8,1], index: 2, kind: input, shape index: {}]   ;;  %s541_s3 = inlined_call_operand.vmem [shape: f32[8,1], index: 3, kind: input, shape index: {}]   ;;  %s542_s4 = inlined_call_operand.vmem [shape: f32[2,8,256], index: 4, kind: output, shape index: {}]  }
   0x1   :  { %s500_s17 = smov 0  }
   0x2 LB: > { %s26_s18 = sadd.s32 1, %s464_s16  ;;  %p408_p0 = scmp.ge.s32.totalorder %s468_s17, 1  ;;  %s468_s17 = sphi %s500_s17, %s14_s17   ;;  %s464_s16 = sphi %s498_s16, %s544_s16   ;;  %s460_s15 = sphi %s496_s15, %s543_s15  }
   0x3   : > { %p28_p1 = scmp.ge.s32.totalorder %s26_s18, 2  ;;  %p183_p2 = scmp.lt.s32.totalorder %s468_s17, 3 }
   0x5   : > { %s546_s18 = smov (%p28_p1, %s26_s18), 0  ;;  %p184_p3 = pnand %p408_p0, %p183_p2 }
   0x6   : > { %p218_p4 = scmp.lt.s32.totalorder (!%p184_p3), %s460_s15, 1  ;;  %v470_v0 = vmov (!%p184_p3), 0   ;;  %v297_v1 = vld [vmem:[%s540_s2] sm:$0xff] (!%p184_p3)  ;;  %vm249_vm0 = vcmask (!%p184_p3), 1041408   ;;  %vm245_vm1 = vcmask (!%p184_p3), 31744  }
   0x7   : > { %187 = sbr.rel (%p184_p3) target bundleno = 246 (0xf6), region = 36  ;;  %288 = vmatprep.mubr.bf16.mxu0 (!%p184_p3), %v470_v0  ;;  %444 = vset.pattern.permute.xlu0 (!%p184_p3), %v470_v0  ;;  %v305_v2 = vld [vmem:[%s541_s3] sm:$0xff] (!%p184_p3) }
   0x8   : > { %300 = vperm.xlu0 (!%p184_p3), %444, %v297_v1   ;;  %v244_v8 = vld [vmem:[%s539_s1] sm:$0xf] (!%p184_p3) }
   0xc   : > { %308 = vperm.xlu0 (!%p184_p3), %444, %v305_v2  }
   0xe   : > { %s548_s15 = smov (!%p218_p4, %s460_s15), 1 }
   0xf   : > { %s417_s23 = sshll.u32 %s548_s15, 3  ;;  %s418_s29 = sshll.u32 %s548_s15, 4 }
  0x10   : > { %s225_s26 = scalar_lea.vmem %s538_s0, %s417_s23  ;;  %s235_s6 = scalar_lea.vmem %s542_s4, %s418_s29 }
  0x11   : > { %v238_v3 = vld [vmem:[%s225_s26] sm:$0xff] }
  0x12   : > { %v240_v4 = vcombine.high %v238_v3, %v238_v3  ;;  %v242_v5 = vpack.c.bf16 %v238_v3, %v238_v3 }
  0x14   : > { %v243_v6 = vpack.c.bf16 %v240_v4, %v240_v4  ;;  %v251_v7 = vsel %vm249_vm0, %v242_v5, 0 }
  0x16   : > { %413 = vmatprep.subr.msk.bf16.mxu0 %vm249_vm0, %v243_v6 }
  0x17   : > { %257 = vmatpush1.bf16.msra.mxu0 %v251_v7 }
  0x1a   : > { %414 = vmatmul.mubr.msk.bf16.vlgmr.msra.gmra.mrb[0].mxu0 %vm245_vm1, %v244_v8 }
  0x87   : > { %v301_v9 = vpop.permute.xlu0 %300 }
  0x8b   : > { %v309_v13 = vpop.permute.xlu0 %308 }
  0xed   : > { %v290_v10 = vpop.f32.mrb[0].mxu0 }
  0xee   : > { %v303_v11 = vmul.f32 %v301_v9, %v290_v10  ;;  %v292_v12 = vpop.f32.mrb[1].mxu0 }
  0xef   : > { %v304_v14 = vmul.f32 %v301_v9, %v292_v12  ;;  %v294_v15 = vpop.f32.mrb[2].mxu0 }
  0xf0   : > { %v311_v16 = vadd.f32 %v309_v13, %v303_v11  ;;  %v295_v17 = vpop.f32.mrb[3].mxu0 }
  0xf1   : > { %v312_v18 = vadd.f32 %v309_v13, %v304_v14 }
  0xf2   : > { %v313_v19 = vmax.f32 %v311_v16, 0.0 }
  0xf3   : > { %v314_v20 = vmax.f32 %v312_v18, 0.0 }
  0xf4   : > { %315 = vst [vmem:[%s235_s6] sm:$0xff] %v313_v19 }
  0xf5   : > { %316 = vst [vmem:[%s235_s6 + $0x8] sm:$0xff] %v314_v20 }
  0xf6 PF: > { %s14_s17 = sadd.s32 1, %s468_s17   ;;  %s543_s15 = smov %s464_s16 }
  0xf7   : > { %p11_p5 = scmp.ge.s32.totalorder %s14_s17, 4   ;;  %s544_s16 = smov %s546_s18 }
  0xf9   :  { %13 = sbr.rel (!%p11_p5) target bundleno = 2 (0x2), region = 66 }

</bundles_post_ra>
